<compile_context>
chip_gen: v7x
topology: tpu7x:2x2x1
jax: 0.10.0
libtpu: 0.0.40
codegen_flags: <defaults>
</compile_context>

<pallas_src>
import functools

import jax
import jax.numpy as jnp
from jax import lax
from jax.experimental import pallas as pl
from jax.experimental.pallas import tpu as pltpu


def _round_up(a: int, b: int) -> int:
    return (a + b - 1) // b * b


def _gelu(x, exact: bool):
    if exact:
        # torch.nn.GELU(approximate='none'): 0.5*x*(1+erf(x/sqrt(2)))
        return 0.5 * x * (1.0 + lax.erf(x * (1.0 / jnp.sqrt(2.0)).astype(x.dtype)))
    # tanh approximation -> transcendental goes to the EUP slot.
    return jax.nn.gelu(x, approximate=True)


def _resblock_kernel(x_ref, gamma_ref, beta_ref,
                     w1_ref, b1_ref, w2_ref, b2_ref,
                     o_ref, *, exact_gelu: bool):
    eps = 1e-5
    x = x_ref[...].astype(jnp.float32)                                  # (tm, C)

    # --- LayerNorm over channels (lane axis), f32 ---
    mean = jnp.mean(x, axis=-1, keepdims=True)
    xc = x - mean
    var = jnp.mean(xc * xc, axis=-1, keepdims=True)
    xn = xc * lax.rsqrt(var + eps)
    xn = xn * gamma_ref[...].astype(jnp.float32) + beta_ref[...].astype(jnp.float32)

    # --- MLP: Linear -> GELU -> Linear.  Matmul inputs in the weights' dtype
    # (bf16 on the fast path), accumulation in f32 on the MXU. ---
    h = jnp.dot(xn.astype(w1_ref.dtype), w1_ref[...],
                preferred_element_type=jnp.float32) + b1_ref[...].astype(jnp.float32)
    h = _gelu(h, exact_gelu)
    y = jnp.dot(h.astype(w2_ref.dtype), w2_ref[...],
                preferred_element_type=jnp.float32) + b2_ref[...].astype(jnp.float32)

    # --- residual (against the normalized x), single lane-dense store ---
    o_ref[...] = (xn + y).astype(o_ref.dtype)


def simple_res_block(x, gamma, beta, w1, b1, w2, b2, *,
                     tm: int = 256, use_bf16: bool = True, exact_gelu: bool = False):
    """SimpleResBlock forward.  x: (..., C).  w1/w2 are stored (C_in, C_out) = torch W.T."""
    orig_shape = x.shape
    C = orig_shape[-1]
    xt = x.reshape(-1, C)                                               # (tokens, C)
    T = xt.shape[0]

    # Token tile: large for MXU fill / per-step amortization, shrunk for tiny
    # inputs, always a multiple of 8 (f32 sublane).  Pad tokens instead of
    # asserting divisibility.
    tm_eff = min(_round_up(tm, 8), _round_up(T, 8))
    T_pad = _round_up(T, tm_eff)
    if T_pad != T:
        xt = jnp.pad(xt, ((0, T_pad - T), (0, 0)))
    grid = (T_pad // tm_eff,)

    mm_dtype = jnp.bfloat16 if use_bf16 else jnp.float32
    w1k = w1.astype(mm_dtype)
    w2k = w2.astype(mm_dtype)
    gamma2 = gamma.reshape(1, C).astype(jnp.float32)
    beta2 = beta.reshape(1, C).astype(jnp.float32)
    b1_2 = b1.reshape(1, C).astype(jnp.float32)
    b2_2 = b2.reshape(1, C).astype(jnp.float32)

    # Explicit VMEM budget: double-buffered x/out tiles + weights + f32 temps,
    # 1.5x headroom, clamped to [32 MiB, 128 MiB].
    x_bytes = jnp.dtype(x.dtype).itemsize
    tile_bytes = tm_eff * C * x_bytes
    weight_bytes = 2 * C * C * jnp.dtype(mm_dtype).itemsize
    temp_bytes = 4 * tm_eff * C * 4                     # xn / h / y f32 temporaries
    need = 2 * 2 * tile_bytes + 2 * weight_bytes + temp_bytes + 8 * C * 4
    vmem_limit = int(min(max(3 * need // 2, 32 * 1024 * 1024), 128 * 1024 * 1024))

    kernel = functools.partial(_resblock_kernel, exact_gelu=exact_gelu)

    def build(single_buffer_params: bool):
        def const_spec(shape):
            # Grid-invariant operand: index_map is constant; request a single
            # VMEM buffer (it is never re-fetched) to save VMEM for bigger tm.
            kwargs = {}
            if single_buffer_params:
                kwargs["pipeline_mode"] = pl.Buffered(1)
            return pl.BlockSpec(shape, lambda i: (0, 0), **kwargs)

        return pl.pallas_call(
            kernel,
            out_shape=jax.ShapeDtypeStruct((T_pad, C), x.dtype),
            grid_spec=pltpu.PrefetchScalarGridSpec(
                num_scalar_prefetch=0,
                grid=grid,
                in_specs=[
                    pl.BlockSpec((tm_eff, C), lambda i: (i, 0)),        # x tile
                    const_spec((1, C)),                                 # gamma
                    const_spec((1, C)),                                 # beta
                    const_spec((C, C)),                                 # w1
                    const_spec((1, C)),                                 # b1
                    const_spec((C, C)),                                 # w2
                    const_spec((1, C)),                                 # b2
                ],
                out_specs=pl.BlockSpec((tm_eff, C), lambda i: (i, 0)),
            ),
            compiler_params=pltpu.CompilerParams(
                dimension_semantics=("parallel",),      # shard tokens across TCs (v7x)
                vmem_limit_bytes=vmem_limit,
            ),
        )

    args = (xt, gamma2, beta2, w1k, b1_2, w2k, b2_2)
    try:
        out = build(True)(*args)
    except Exception:
        # pipeline_mode=pl.Buffered(1) unsupported on this jax build: fall back
        # to default double-buffering (correct, slightly more VMEM).
        out = build(False)(*args)

    if T_pad != T:
        out = out[:T]
    return out.reshape(orig_shape)


def _ref_forward(x, gamma, beta, w1, b1, w2, b2):
    # Pure-JAX reference mirroring the PyTorch module (f32, exact erf GELU).
    eps = 1e-5
    mean = jnp.mean(x, axis=-1, keepdims=True)
    var = jnp.mean((x - mean) ** 2, axis=-1, keepdims=True)
    xn = (x - mean) / jnp.sqrt(var + eps) * gamma + beta
    h = xn @ w1 + b1
    h = 0.5 * h * (1.0 + lax.erf(h / jnp.sqrt(2.0)))
    y = h @ w2 + b2
    return xn + y


if __name__ == "__main__":
    key = jax.random.PRNGKey(0)
    B, S, C = 2, 8, 128   # batch=2, seq=8, channels=128 (lane-aligned)

    k = jax.random.split(key, 5)
    x = jax.random.normal(k[0], (B, S, C), dtype=jnp.float32)

    # Deterministic parameter init (nn.LayerNorm(C), nn.Linear(C, C) x2).
    gamma = jnp.ones((C,), jnp.float32)
    beta = jnp.zeros((C,), jnp.float32)
    bound = 1.0 / (C ** 0.5)
    w1 = jax.random.uniform(k[1], (C, C), jnp.float32, -bound, bound)   # (in, out) = torch W.T
    b1 = jax.random.uniform(k[2], (C,), jnp.float32, -bound, bound)
    w2 = jax.random.uniform(k[3], (C, C), jnp.float32, -bound, bound)
    b2 = jax.random.uniform(k[4], (C,), jnp.float32, -bound, bound)

    ref = _ref_forward(x, gamma, beta, w1, b1, w2, b2)

    # Fast path (default): bf16-input MXU matmuls (f32 acc) + tanh GELU.
    out_fast = simple_res_block(x, gamma, beta, w1, b1, w2, b2,
                                tm=256, use_bf16=True, exact_gelu=False)
    out_fast = jax.block_until_ready(out_fast)
    assert out_fast.shape == x.shape
    assert jnp.allclose(out_fast, ref, atol=3e-2, rtol=3e-2), "fast path mismatch vs reference"

    # Precise path: f32 matmuls + exact erf GELU (torch bit semantics).
    out_precise = simple_res_block(x, gamma, beta, w1, b1, w2, b2,
                                   tm=256, use_bf16=False, exact_gelu=True)
    out_precise = jax.block_until_ready(out_precise)
    assert jnp.allclose(out_precise, ref, atol=1e-3, rtol=1e-3), "precise path mismatch vs reference"

    print("KERNEL_OK")
</pallas_src>

<mosaic_0001>
module attributes {stable_mosaic.version = 11 : i64} {
  func.func @_resblock_kernel(%arg0: i32, %arg1: memref<16x128xf32, #tpu.memory_space<vmem>>, %arg2: memref<1x128xf32, #tpu.memory_space<vmem>>, %arg3: memref<1x128xf32, #tpu.memory_space<vmem>>, %arg4: memref<128x128xbf16, #tpu.memory_space<vmem>>, %arg5: memref<1x128xf32, #tpu.memory_space<vmem>>, %arg6: memref<128x128xbf16, #tpu.memory_space<vmem>>, %arg7: memref<1x128xf32, #tpu.memory_space<vmem>>, %arg8: memref<16x128xf32, #tpu.memory_space<vmem>>) attributes {dimension_semantics = [#tpu.dimension_semantics<parallel>], iteration_bounds = array<i64: 1>, scalar_prefetch = 0 : i64, scratch_operands = 0 : i64, tpu.core_type = #tpu.core_type<tc>, window_params = [{transform_indices = @transform_0, window_bounds = array<i64: 16, 128>}, {pipeline_mode = #tpu.pipeline_mode<synchronous>, transform_indices = @transform_1, window_bounds = array<i64: 1, 128>}, {pipeline_mode = #tpu.pipeline_mode<synchronous>, transform_indices = @transform_2, window_bounds = array<i64: 1, 128>}, {pipeline_mode = #tpu.pipeline_mode<synchronous>, transform_indices = @transform_3, window_bounds = array<i64: 128, 128>}, {pipeline_mode = #tpu.pipeline_mode<synchronous>, transform_indices = @transform_4, window_bounds = array<i64: 1, 128>}, {pipeline_mode = #tpu.pipeline_mode<synchronous>, transform_indices = @transform_5, window_bounds = array<i64: 128, 128>}, {pipeline_mode = #tpu.pipeline_mode<synchronous>, transform_indices = @transform_6, window_bounds = array<i64: 1, 128>}, {transform_indices = @transform_7, window_bounds = array<i64: 16, 128>}]} {
    %c0 = arith.constant 0 : index
    %c0_0 = arith.constant 0 : index
    %0 = vector.load %arg1[%c0, %c0_0] : memref<16x128xf32, #tpu.memory_space<vmem>>, vector<16x128xf32>
    %cst = arith.constant dense<0.000000e+00> : vector<16xf32>
    %1 = vector.multi_reduction <add>, %0, %cst [1] : vector<16x128xf32> to vector<16xf32>
    %2 = vector.shape_cast %1 : vector<16xf32> to vector<16x1xf32>
    %cst_1 = arith.constant 1.280000e+02 : f32
    %3 = vector.broadcast %cst_1 : f32 to vector<16x1xf32>
    %4 = arith.divf %2, %3 : vector<16x1xf32>
    %5 = vector.broadcast %4 : vector<16x1xf32> to vector<16x128xf32>
    %6 = arith.subf %0, %5 : vector<16x128xf32>
    %7 = arith.mulf %6, %6 : vector<16x128xf32>
    %cst_2 = arith.constant dense<0.000000e+00> : vector<16xf32>
    %8 = vector.multi_reduction <add>, %7, %cst_2 [1] : vector<16x128xf32> to vector<16xf32>
    %9 = vector.shape_cast %8 : vector<16xf32> to vector<16x1xf32>
    %cst_3 = arith.constant 1.280000e+02 : f32
    %10 = vector.broadcast %cst_3 : f32 to vector<16x1xf32>
    %11 = arith.divf %9, %10 : vector<16x1xf32>
    %cst_4 = arith.constant 9.99999974E-6 : f32
    %12 = vector.broadcast %cst_4 : f32 to vector<16x1xf32>
    %13 = arith.addf %11, %12 : vector<16x1xf32>
    %14 = math.rsqrt %13 : vector<16x1xf32>
    %15 = vector.broadcast %14 : vector<16x1xf32> to vector<16x128xf32>
    %16 = arith.mulf %6, %15 : vector<16x128xf32>
    %c0_5 = arith.constant 0 : index
    %c0_6 = arith.constant 0 : index
    %17 = vector.load %arg2[%c0_5, %c0_6] : memref<1x128xf32, #tpu.memory_space<vmem>>, vector<1x128xf32>
    %18 = vector.broadcast %17 : vector<1x128xf32> to vector<16x128xf32>
    %19 = arith.mulf %16, %18 : vector<16x128xf32>
    %c0_7 = arith.constant 0 : index
    %c0_8 = arith.constant 0 : index
    %20 = vector.load %arg3[%c0_7, %c0_8] : memref<1x128xf32, #tpu.memory_space<vmem>>, vector<1x128xf32>
    %21 = vector.broadcast %20 : vector<1x128xf32> to vector<16x128xf32>
    %22 = arith.addf %19, %21 : vector<16x128xf32>
    %23 = arith.truncf %22 : vector<16x128xf32> to vector<16x128xbf16>
    %c0_9 = arith.constant 0 : index
    %c0_10 = arith.constant 0 : index
    %24 = vector.load %arg4[%c0_9, %c0_10] : memref<128x128xbf16, #tpu.memory_space<vmem>>, vector<128x128xbf16>
    %cst_11 = arith.constant dense<0.000000e+00> : vector<16x128xf32>
    %25 = tpu.matmul %23, %24, %cst_11 {dimension_numbers = #tpu.dot_dimension_numbers<[1], [0], [0], [1], [0, 0, 1, 1], [], []>} : vector<16x128xbf16>, vector<128x128xbf16>, vector<16x128xf32> -> vector<16x128xf32>
    %c0_12 = arith.constant 0 : index
    %c0_13 = arith.constant 0 : index
    %26 = vector.load %arg5[%c0_12, %c0_13] : memref<1x128xf32, #tpu.memory_space<vmem>>, vector<1x128xf32>
    %27 = vector.broadcast %26 : vector<1x128xf32> to vector<16x128xf32>
    %28 = arith.addf %25, %27 : vector<16x128xf32>
    %29 = arith.mulf %28, %28 : vector<16x128xf32>
    %30 = arith.mulf %28, %29 : vector<16x128xf32>
    %cst_14 = arith.constant 4.471500e-02 : f32
    %31 = vector.broadcast %cst_14 : f32 to vector<16x128xf32>
    %32 = arith.mulf %31, %30 : vector<16x128xf32>
    %33 = arith.addf %28, %32 : vector<16x128xf32>
    %cst_15 = arith.constant 0.797884583 : f32
    %34 = vector.broadcast %cst_15 : f32 to vector<16x128xf32>
    %35 = arith.mulf %34, %33 : vector<16x128xf32>
    %36 = math.tanh %35 : vector<16x128xf32>
    %cst_16 = arith.constant 1.000000e+00 : f32
    %37 = vector.broadcast %cst_16 : f32 to vector<16x128xf32>
    %38 = arith.addf %37, %36 : vector<16x128xf32>
    %cst_17 = arith.constant 5.000000e-01 : f32
    %39 = vector.broadcast %cst_17 : f32 to vector<16x128xf32>
    %40 = arith.mulf %39, %38 : vector<16x128xf32>
    %41 = arith.mulf %28, %40 : vector<16x128xf32>
    %42 = arith.truncf %41 : vector<16x128xf32> to vector<16x128xbf16>
    %c0_18 = arith.constant 0 : index
    %c0_19 = arith.constant 0 : index
    %43 = vector.load %arg6[%c0_18, %c0_19] : memref<128x128xbf16, #tpu.memory_space<vmem>>, vector<128x128xbf16>
    %cst_20 = arith.constant dense<0.000000e+00> : vector<16x128xf32>
    %44 = tpu.matmul %42, %43, %cst_20 {dimension_numbers = #tpu.dot_dimension_numbers<[1], [0], [0], [1], [0, 0, 1, 1], [], []>} : vector<16x128xbf16>, vector<128x128xbf16>, vector<16x128xf32> -> vector<16x128xf32>
    %c0_21 = arith.constant 0 : index
    %c0_22 = arith.constant 0 : index
    %45 = vector.load %arg7[%c0_21, %c0_22] : memref<1x128xf32, #tpu.memory_space<vmem>>, vector<1x128xf32>
    %46 = vector.broadcast %45 : vector<1x128xf32> to vector<16x128xf32>
    %47 = arith.addf %44, %46 : vector<16x128xf32>
    %48 = arith.addf %22, %47 : vector<16x128xf32>
    %c0_23 = arith.constant 0 : index
    %c0_24 = arith.constant 0 : index
    %49 = vector.load %arg8[%c0_23, %c0_24] : memref<16x128xf32, #tpu.memory_space<vmem>>, vector<16x128xf32>
    tpu.vector_store %arg8[%c0_23, %c0_24], %48 {strides = array<i32>} : memref<16x128xf32, #tpu.memory_space<vmem>>, vector<16x128xf32>,
    return
  }
  func.func @transform_0(%arg0: i32) -> (i32, i32) {
    %c0_i32 = arith.constant 0 : i32
    %c0_i32_0 = arith.constant 0 : i32
    return %arg0, %c0_i32 : i32, i32
  }
  func.func @transform_1(%arg0: i32) -> (i32, i32) {
    %c0_i32 = arith.constant 0 : i32
    %c0_i32_0 = arith.constant 0 : i32
    %c0_i32_1 = arith.constant 0 : i32
    return %c0_i32, %c0_i32_0 : i32, i32
  }
  func.func @transform_2(%arg0: i32) -> (i32, i32) {
    %c0_i32 = arith.constant 0 : i32
    %c0_i32_0 = arith.constant 0 : i32
    %c0_i32_1 = arith.constant 0 : i32
    return %c0_i32, %c0_i32_0 : i32, i32
  }
  func.func @transform_3(%arg0: i32) -> (i32, i32) {
    %c0_i32 = arith.constant 0 : i32
    %c0_i32_0 = arith.constant 0 : i32
    %c0_i32_1 = arith.constant 0 : i32
    return %c0_i32, %c0_i32_0 : i32, i32
  }
  func.func @transform_4(%arg0: i32) -> (i32, i32) {
    %c0_i32 = arith.constant 0 : i32
    %c0_i32_0 = arith.constant 0 : i32
    %c0_i32_1 = arith.constant 0 : i32
    return %c0_i32, %c0_i32_0 : i32, i32
  }
  func.func @transform_5(%arg0: i32) -> (i32, i32) {
    %c0_i32 = arith.constant 0 : i32
    %c0_i32_0 = arith.constant 0 : i32
    %c0_i32_1 = arith.constant 0 : i32
    return %c0_i32, %c0_i32_0 : i32, i32
  }
  func.func @transform_6(%arg0: i32) -> (i32, i32) {
    %c0_i32 = arith.constant 0 : i32
    %c0_i32_0 = arith.constant 0 : i32
    %c0_i32_1 = arith.constant 0 : i32
    return %c0_i32, %c0_i32_0 : i32, i32
  }
  func.func @transform_7(%arg0: i32) -> (i32, i32) {
    %c0_i32 = arith.constant 0 : i32
    %c0_i32_0 = arith.constant 0 : i32
    return %arg0, %c0_i32 : i32, i32
  }
}

module attributes {stable_mosaic.version = 11 : i64} {
  func.func @_resblock_kernel(%arg0: i32, %arg1: memref<16x128xf32, #tpu.memory_space<vmem>>, %arg2: memref<1x128xf32, #tpu.memory_space<vmem>>, %arg3: memref<1x128xf32, #tpu.memory_space<vmem>>, %arg4: memref<128x128xbf16, #tpu.memory_space<vmem>>, %arg5: memref<1x128xf32, #tpu.memory_space<vmem>>, %arg6: memref<128x128xbf16, #tpu.memory_space<vmem>>, %arg7: memref<1x128xf32, #tpu.memory_space<vmem>>, %arg8: memref<16x128xf32, #tpu.memory_space<vmem>>) attributes {dimension_semantics = [#tpu.dimension_semantics<parallel>], iteration_bounds = array<i64: 1>, scalar_prefetch = 0 : i64, scratch_operands = 0 : i64, tpu.core_type = #tpu.core_type<tc>, window_params = [{transform_indices = @transform_0, window_bounds = array<i64: 16, 128>}, {pipeline_mode = #tpu.pipeline_mode<synchronous>, transform_indices = @transform_1, window_bounds = array<i64: 1, 128>}, {pipeline_mode = #tpu.pipeline_mode<synchronous>, transform_indices = @transform_2, window_bounds = array<i64: 1, 128>}, {pipeline_mode = #tpu.pipeline_mode<synchronous>, transform_indices = @transform_3, window_bounds = array<i64: 128, 128>}, {pipeline_mode = #tpu.pipeline_mode<synchronous>, transform_indices = @transform_4, window_bounds = array<i64: 1, 128>}, {pipeline_mode = #tpu.pipeline_mode<synchronous>, transform_indices = @transform_5, window_bounds = array<i64: 128, 128>}, {pipeline_mode = #tpu.pipeline_mode<synchronous>, transform_indices = @transform_6, window_bounds = array<i64: 1, 128>}, {transform_indices = @transform_7, window_bounds = array<i64: 16, 128>}]} {
    %c0 = arith.constant 0 : index
    %c0_0 = arith.constant 0 : index
    %0 = vector.load %arg1[%c0, %c0_0] : memref<16x128xf32, #tpu.memory_space<vmem>>, vector<16x128xf32>
    %cst = arith.constant dense<0.000000e+00> : vector<16xf32>
    %1 = vector.multi_reduction <add>, %0, %cst [1] : vector<16x128xf32> to vector<16xf32>
    %2 = vector.shape_cast %1 : vector<16xf32> to vector<16x1xf32>
    %cst_1 = arith.constant 1.280000e+02 : f32
    %3 = vector.broadcast %cst_1 : f32 to vector<16x1xf32>
    %4 = arith.divf %2, %3 : vector<16x1xf32>
    %5 = vector.broadcast %4 : vector<16x1xf32> to vector<16x128xf32>
    %6 = arith.subf %0, %5 : vector<16x128xf32>
    %7 = arith.mulf %6, %6 : vector<16x128xf32>
    %cst_2 = arith.constant dense<0.000000e+00> : vector<16xf32>
    %8 = vector.multi_reduction <add>, %7, %cst_2 [1] : vector<16x128xf32> to vector<16xf32>
    %9 = vector.shape_cast %8 : vector<16xf32> to vector<16x1xf32>
    %cst_3 = arith.constant 1.280000e+02 : f32
    %10 = vector.broadcast %cst_3 : f32 to vector<16x1xf32>
    %11 = arith.divf %9, %10 : vector<16x1xf32>
    %cst_4 = arith.constant 9.99999974E-6 : f32
    %12 = vector.broadcast %cst_4 : f32 to vector<16x1xf32>
    %13 = arith.addf %11, %12 : vector<16x1xf32>
    %14 = math.rsqrt %13 : vector<16x1xf32>
    %15 = vector.broadcast %14 : vector<16x1xf32> to vector<16x128xf32>
    %16 = arith.mulf %6, %15 : vector<16x128xf32>
    %c0_5 = arith.constant 0 : index
    %c0_6 = arith.constant 0 : index
    %17 = vector.load %arg2[%c0_5, %c0_6] : memref<1x128xf32, #tpu.memory_space<vmem>>, vector<1x128xf32>
    %18 = vector.broadcast %17 : vector<1x128xf32> to vector<16x128xf32>
    %19 = arith.mulf %16, %18 : vector<16x128xf32>
    %c0_7 = arith.constant 0 : index
    %c0_8 = arith.constant 0 : index
    %20 = vector.load %arg3[%c0_7, %c0_8] : memref<1x128xf32, #tpu.memory_space<vmem>>, vector<1x128xf32>
    %21 = vector.broadcast %20 : vector<1x128xf32> to vector<16x128xf32>
    %22 = arith.addf %19, %21 : vector<16x128xf32>
    %23 = arith.truncf %22 : vector<16x128xf32> to vector<16x128xbf16>
    %c0_9 = arith.constant 0 : index
    %c0_10 = arith.constant 0 : index
    %24 = vector.load %arg4[%c0_9, %c0_10] : memref<128x128xbf16, #tpu.memory_space<vmem>>, vector<128x128xbf16>
    %cst_11 = arith.constant dense<0.000000e+00> : vector<16x128xf32>
    %25 = tpu.matmul %23, %24, %cst_11 {dimension_numbers = #tpu.dot_dimension_numbers<[1], [0], [0], [1], [0, 0, 1, 1], [], []>} : vector<16x128xbf16>, vector<128x128xbf16>, vector<16x128xf32> -> vector<16x128xf32>
    %c0_12 = arith.constant 0 : index
    %c0_13 = arith.constant 0 : index
    %26 = vector.load %arg5[%c0_12, %c0_13] : memref<1x128xf32, #tpu.memory_space<vmem>>, vector<1x128xf32>
    %27 = vector.broadcast %26 : vector<1x128xf32> to vector<16x128xf32>
    %28 = arith.addf %25, %27 : vector<16x128xf32>
    %29 = arith.mulf %28, %28 : vector<16x128xf32>
    %30 = arith.mulf %28, %29 : vector<16x128xf32>
    %cst_14 = arith.constant 4.471500e-02 : f32
    %31 = vector.broadcast %cst_14 : f32 to vector<16x128xf32>
    %32 = arith.mulf %31, %30 : vector<16x128xf32>
    %33 = arith.addf %28, %32 : vector<16x128xf32>
    %cst_15 = arith.constant 0.797884583 : f32
    %34 = vector.broadcast %cst_15 : f32 to vector<16x128xf32>
    %35 = arith.mulf %34, %33 : vector<16x128xf32>
    %36 = math.tanh %35 : vector<16x128xf32>
    %cst_16 = arith.constant 1.000000e+00 : f32
    %37 = vector.broadcast %cst_16 : f32 to vector<16x128xf32>
    %38 = arith.addf %37, %36 : vector<16x128xf32>
    %cst_17 = arith.constant 5.000000e-01 : f32
    %39 = vector.broadcast %cst_17 : f32 to vector<16x128xf32>
    %40 = arith.mulf %39, %38 : vector<16x128xf32>
    %41 = arith.mulf %28, %40 : vector<16x128xf32>
    %42 = arith.truncf %41 : vector<16x128xf32> to vector<16x128xbf16>
    %c0_18 = arith.constant 0 : index
    %c0_19 = arith.constant 0 : index
    %43 = vector.load %arg6[%c0_18, %c0_19] : memref<128x128xbf16, #tpu.memory_space<vmem>>, vector<128x128xbf16>
    %cst_20 = arith.constant dense<0.000000e+00> : vector<16x128xf32>
    %44 = tpu.matmul %42, %43, %cst_20 {dimension_numbers = #tpu.dot_dimension_numbers<[1], [0], [0], [1], [0, 0, 1, 1], [], []>} : vector<16x128xbf16>, vector<128x128xbf16>, vector<16x128xf32> -> vector<16x128xf32>
    %c0_21 = arith.constant 0 : index
    %c0_22 = arith.constant 0 : index
    %45 = vector.load %arg7[%c0_21, %c0_22] : memref<1x128xf32, #tpu.memory_space<vmem>>, vector<1x128xf32>
    %46 = vector.broadcast %45 : vector<1x128xf32> to vector<16x128xf32>
    %47 = arith.addf %44, %46 : vector<16x128xf32>
    %48 = arith.addf %22, %47 : vector<16x128xf32>
    %c0_23 = arith.constant 0 : index
    %c0_24 = arith.constant 0 : index
    %49 = vector.load %arg8[%c0_23, %c0_24] : memref<16x128xf32, #tpu.memory_space<vmem>>, vector<16x128xf32>
    tpu.vector_store %arg8[%c0_23, %c0_24], %48 {strides = array<i32>} : memref<16x128xf32, #tpu.memory_space<vmem>>, vector<16x128xf32>,
    return
  }
  func.func @transform_0(%arg0: i32) -> (i32, i32) {
    %c0_i32 = arith.constant 0 : i32
    %c0_i32_0 = arith.constant 0 : i32
    return %arg0, %c0_i32 : i32, i32
  }
  func.func @transform_1(%arg0: i32) -> (i32, i32) {
    %c0_i32 = arith.constant 0 : i32
    %c0_i32_0 = arith.constant 0 : i32
    %c0_i32_1 = arith.constant 0 : i32
    return %c0_i32, %c0_i32_0 : i32, i32
  }
  func.func @transform_2(%arg0: i32) -> (i32, i32) {
    %c0_i32 = arith.constant 0 : i32
    %c0_i32_0 = arith.constant 0 : i32
    %c0_i32_1 = arith.constant 0 : i32
    return %c0_i32, %c0_i32_0 : i32, i32
  }
  func.func @transform_3(%arg0: i32) -> (i32, i32) {
    %c0_i32 = arith.constant 0 : i32
    %c0_i32_0 = arith.constant 0 : i32
    %c0_i32_1 = arith.constant 0 : i32
    return %c0_i32, %c0_i32_0 : i32, i32
  }
  func.func @transform_4(%arg0: i32) -> (i32, i32) {
    %c0_i32 = arith.constant 0 : i32
    %c0_i32_0 = arith.constant 0 : i32
    %c0_i32_1 = arith.constant 0 : i32
    return %c0_i32, %c0_i32_0 : i32, i32
  }
  func.func @transform_5(%arg0: i32) -> (i32, i32) {
    %c0_i32 = arith.constant 0 : i32
    %c0_i32_0 = arith.constant 0 : i32
    %c0_i32_1 = arith.constant 0 : i32
    return %c0_i32, %c0_i32_0 : i32, i32
  }
  func.func @transform_6(%arg0: i32) -> (i32, i32) {
    %c0_i32 = arith.constant 0 : i32
    %c0_i32_0 = arith.constant 0 : i32
    %c0_i32_1 = arith.constant 0 : i32
    return %c0_i32, %c0_i32_0 : i32, i32
  }
  func.func @transform_7(%arg0: i32) -> (i32, i32) {
    %c0_i32 = arith.constant 0 : i32
    %c0_i32_0 = arith.constant 0 : i32
    return %arg0, %c0_i32 : i32, i32
  }
}

</mosaic_0001>

<bundles_post_ra>
// kernel: tpu_custom_call.1
= control target key start
LH: loop header
LB: loop body
LE: loop exit
PB: predicated region body
PF: predicated region fallthrough
CT: control target
= control target key end

     0   :  { %12 = vsyncpa [#allocation3], 0  ;;  %s732_s0 = inlined_call_operand.hbm [shape: f32[16,128], index: 0, kind: input, shape index: {}]   ;;  %s733_s1 = inlined_call_operand.vmem [shape: f32[1,128], index: 1, kind: input, shape index: {}]   ;;  %s734_s2 = inlined_call_operand.vmem [shape: f32[1,128], index: 2, kind: input, shape index: {}]   ;;  %s735_s3 = inlined_call_operand.hbm [shape: bf16[128,128], index: 3, kind: input, shape index: {}]   ;;  %s736_s4 = inlined_call_operand.vmem [shape: f32[1,128], index: 4, kind: input, shape index: {}]   ;;  %s737_s5 = inlined_call_operand.hbm [shape: bf16[128,128], index: 5, kind: input, shape index: {}]   ;;  %s738_s6 = inlined_call_operand.vmem [shape: f32[1,128], index: 6, kind: input, shape index: {}]   ;;  %s739_s7 = inlined_call_operand.hbm [shape: f32[16,128], index: 7, kind: output, shape index: {}]  }
   0x1   :  { %13 = vsyncpa [#allocation6], 0 }
   0x2   :  { %14 = vsyncpa [#allocation4], 0  ;;  %s584_s24 = smov [#allocation5]   ;;  %s490_s28 = scalar_lea.hbm %s735_s3, 1024 }
   0x3   :  { %s36_s25 = sshll.u32 %s584_s24, 4  ;;  %p491_p0 = scmp.ne.s32.totalorder %s735_s3, %s490_s28  ;;  %s37_s25 = int_to_ptr.vmem [resolvable:$true] %s36_s25 }
   0x4   :  { %p494_p1 = scmp.lt.u32.totalorder %s490_s28, %s735_s3 }
   0x6   :  { %p496_p2 = pnand %p494_p1, %p491_p0 }
   0x8   :  { %499 = shalt.err (!%p496_p2)
}
   0x9   :  { %s500_s10 = scalar_lea.vmem %s37_s25, 1024  ;;  %p505_p4 = scmp.lt.s32.totalorder %s37_s25, %s37_s25 }
   0xa   :  { %p501_p3 = scmp.ne.s32.totalorder %s37_s25, %s500_s10  ;;  %p506_p5 = scmp.lt.s32.totalorder %s500_s10, %s500_s10 }
   0xc   :  { %p507_p6 = por %p506_p5, %p505_p4 }
   0xe   :  { %p508_p7 = pnand %p507_p6, %p501_p3 }
  0x10   :  { %511 = shalt.err (!%p508_p7)
}
  0x11   :  { %s585_s11 = smov 64   ;;  %s586_s12 = smov 4  }
  0x12   :  { %42 = dma.hbm_to_vmem [thread:$0]  %s735_s3, 1024, %s37_s25, [#allocation6], %s585_s11, %s585_s11, %s586_s12  }
  0x13   :  { %s587_s15 = smov [#allocation2]   ;;  %s512_s19 = scalar_lea.hbm %s732_s0, 256 }
  0x14   :  { %s20_s16 = sshll.u32 %s587_s15, 4  ;;  %p513_p8 = scmp.ne.s32.totalorder %s732_s0, %s512_s19  ;;  %s21_s16 = int_to_ptr.vmem [resolvable:$true] %s20_s16 }
  0x15   :  { %p516_p9 = scmp.lt.u32.totalorder %s512_s19, %s732_s0 }
  0x17   :  { %p518_p10 = pnand %p516_p9, %p513_p8 }
  0x19   :  { %521 = shalt.err (!%p518_p10)
}
  0x1a   :  { %s522_s24 = scalar_lea.vmem %s21_s16, 256  ;;  %p527_p12 = scmp.lt.s32.totalorder %s21_s16, %s21_s16 }
  0x1b   :  { %p523_p11 = scmp.ne.s32.totalorder %s21_s16, %s522_s24  ;;  %p528_p13 = scmp.lt.s32.totalorder %s522_s24, %s522_s24 }
  0x1d   :  { %p529_p0 = por %p528_p13, %p527_p12 }
  0x1f   :  { %p530_p1 = pnand %p529_p0, %p523_p11 }
  0x21   :  { %533 = shalt.err (!%p530_p1)
}
  0x22   :  { %s588_s3 = smov 128   ;;  %s589_s25 = smov 8  }
  0x23   :  { %26 = dma.hbm_to_vmem [thread:$0]  %s732_s0, 256, %s21_s16, [#allocation3], %s588_s3, %s588_s3, %s589_s25  }
  0x24   :  { %s590_s28 = smov [#allocation7]   ;;  %s534_s9 = scalar_lea.hbm %s737_s5, 1024 }
  0x25   :  { %s50_s29 = sshll.u32 %s590_s28, 4  ;;  %p535_p2 = scmp.ne.s32.totalorder %s737_s5, %s534_s9  ;;  %s51_s29 = int_to_ptr.vmem [resolvable:$true] %s50_s29 }
  0x26   :  { %p538_p3 = scmp.lt.u32.totalorder %s534_s9, %s737_s5 }
  0x28   :  { %p540_p4 = pnand %p538_p3, %p535_p2 }
  0x2a   :  { %543 = shalt.err (!%p540_p4)
}
  0x2b   :  { %s544_s17 = scalar_lea.vmem %s51_s29, 1024  ;;  %p549_p6 = scmp.lt.s32.totalorder %s51_s29, %s51_s29 }
  0x2c   :  { %p545_p5 = scmp.ne.s32.totalorder %s51_s29, %s544_s17  ;;  %p550_p7 = scmp.lt.s32.totalorder %s544_s17, %s544_s17 }
  0x2e   :  { %p551_p8 = por %p550_p7, %p549_p6 }
  0x30   :  { %p552_p9 = pnand %p551_p8, %p545_p5 }
  0x32   :  { %555 = shalt.err (!%p552_p9)
}
  0x33   :  { %56 = dma.hbm_to_vmem [thread:$0]  %s737_s5, 1024, %s51_s29, [#allocation6], %s585_s11, %s585_s11, %s586_s12  }
  0x34   :  { %578 = dma.done.wait [#allocation3], 256  }
  0x35   :  { %579 = vsyncadd [#allocation3], 4294967040 }
  0x36   :  { %580 = dma.done.wait [#allocation6], 2048  }
  0x37   :  { %581 = vsyncadd [#allocation6], 4294965248  ;;  %v69_v0 = vld [vmem:[#allocation2] sm:$0xff]  ;;  %v70_v1 = vld [vmem:[#allocation2 + $0x8] sm:$0xff]  ;;  %v591_v3 = vmov 0.0   ;;  %vm592_vm0 = vmmov 0  }
  0x38   :  { %71 = vadd.xlane.f32.xlu0 %v69_v0  ;;  %v466_v2 = vld [vmem:[#allocation5] sm:$0xff]   ;;  %416 = vmatprep.subr.bf16.mxu0 %v591_v3  ;;  %v467_v12 = vld [vmem:[#allocation5 + $0x8] sm:$0xff]   ;;  %v468_v13 = vld [vmem:[#allocation5 + $0x10] sm:$0xff]   ;;  %s593_s20 = smov [#allocation8]  }
  0x39   :  { %436 = vmatprep.subr.bf16.mxu1 %v591_v3  ;;  %417 = vmatpush3.bf16.msra.mxu0 %v466_v2  ;;  %v469_v14 = vld [vmem:[#allocation5 + $0x18] sm:$0xff]   ;;  %v470_v15 = vld [vmem:[#allocation5 + $0x20] sm:$0xff]   ;;  %v471_v16 = vld [vmem:[#allocation5 + $0x28] sm:$0xff]   ;;  %s365_s21 = sshll.u32 %s593_s20, 4  ;;  %s366_s21 = int_to_ptr.vmem [resolvable:$true] %s365_s21 }
  0x3a   :  { %418 = vmatprep.subr.bf16.mxu0 %v591_v3  ;;  %432 = vmatprep.mubr.msk.bf16.mxu0 %vm592_vm0, %v591_v3  ;;  %v472_v17 = vld [vmem:[#allocation5 + $0x30] sm:$0xff]   ;;  %v473_v18 = vld [vmem:[#allocation5 + $0x38] sm:$0xff]   ;;  %v474_v36 = vld [vmem:[#allocation7] sm:$0xff]   ;;  %s556_s22 = scalar_lea.vmem %s366_s21, 256  ;;  %p561_p11 = scmp.lt.s32.totalorder %s366_s21, %s366_s21 }
  0x3b   :  { %452 = vmatprep.mubr.msk.bf16.mxu1 %vm592_vm0, %v591_v3  ;;  %v378_v27 = vld [vmem:[%s733_s1] ss:$0 sm:$0xff]  ;;  %437 = vmatpush3.bf16.msra.mxu1 %v474_v36  ;;  %v475_v37 = vld [vmem:[#allocation7 + $0x8] sm:$0xff]   ;;  %v477_v39 = vld [vmem:[#allocation7 + $0x18] sm:$0xff]   ;;  %p557_p10 = scmp.ne.s32.totalorder %s366_s21, %s556_s22  ;;  %p562_p12 = scmp.lt.s32.totalorder %s556_s22, %s556_s22 }
  0x3c   :  { %73 = vadd.xlane.f32.xlu0 %v70_v1  ;;  %v379_v31 = vld [vmem:[%s734_s2] ss:$0 sm:$0xff]  ;;  %438 = vmatprep.subr.bf16.mxu1 %v591_v3  ;;  %v478_v40 = vld [vmem:[#allocation7 + $0x20] sm:$0xff]   ;;  %v479_v41 = vld [vmem:[#allocation7 + $0x28] sm:$0xff]  }
  0x3d   :  { %419 = vmatpush3.bf16.msra.mxu0 %v467_v12  ;;  %v476_v38 = vld [vmem:[#allocation7 + $0x10] sm:$0xff]   ;;  %v481_v43 = vld [vmem:[#allocation7 + $0x38] sm:$0xff]   ;;  %p563_p13 = por %p562_p12, %p561_p11 }
  0x3e   :  { %420 = vmatprep.subr.bf16.mxu0 %v591_v3  ;;  %v480_v42 = vld [vmem:[#allocation7 + $0x30] sm:$0xff]  }
  0x3f   :  { %439 = vmatpush3.bf16.msra.mxu1 %v475_v37  ;;  %v380_v44 = vld [vmem:[%s736_s4] ss:$0 sm:$0xff]  ;;  %p564_p0 = pnand %p563_p13, %p557_p10 }
  0x40   :  { %440 = vmatprep.subr.bf16.mxu1 %v591_v3 }
  0x41   :  { %421 = vmatpush3.bf16.msra.mxu0 %v468_v13 }
  0x42   :  { %422 = vmatprep.subr.bf16.mxu0 %v591_v3 }
  0x43   :  { %441 = vmatpush3.bf16.msra.mxu1 %v476_v38 }
  0x44   :  { %442 = vmatprep.subr.bf16.mxu1 %v591_v3 }
  0x45   :  { %423 = vmatpush3.bf16.msra.mxu0 %v469_v14 }
  0x46   :  { %424 = vmatprep.subr.bf16.mxu0 %v591_v3 }
  0x47   :  { %443 = vmatpush3.bf16.msra.mxu1 %v477_v39 }
  0x48   :  { %444 = vmatprep.subr.bf16.mxu1 %v591_v3 }
  0x49   :  { %425 = vmatpush3.bf16.msra.mxu0 %v470_v15 }
  0x4a   :  { %426 = vmatprep.subr.bf16.mxu0 %v591_v3 }
  0x4b   :  { %445 = vmatpush3.bf16.msra.mxu1 %v478_v40 }
  0x4c   :  { %446 = vmatprep.subr.bf16.mxu1 %v591_v3 }
  0x4d   :  { %427 = vmatpush3.bf16.msra.mxu0 %v471_v16 }
  0x4e   :  { %428 = vmatprep.subr.bf16.mxu0 %v591_v3 }
  0x4f   :  { %447 = vmatpush3.bf16.msra.mxu1 %v479_v41 }
  0x50   :  { %448 = vmatprep.subr.bf16.mxu1 %v591_v3 }
  0x51   :  { %429 = vmatpush3.bf16.msra.mxu0 %v472_v17 }
  0x52   :  { %430 = vmatprep.subr.bf16.mxu0 %v591_v3 }
  0x53   :  { %449 = vmatpush3.bf16.msra.mxu1 %v480_v42 }
  0x54   :  { %450 = vmatprep.subr.bf16.mxu1 %v591_v3 }
  0x55   :  { %431 = vmatpush3.bf16.msra.mxu0 %v473_v18 }
  0x57   :  { %451 = vmatpush3.bf16.msra.mxu1 %v481_v43 }
  0xc5   :  { %v72_v4 = vpop.xlane.xlu0 %71 }
  0xc6   :  { %v76_v5 = vmul.f32 0.0078125, %v72_v4 }
  0xc8   :  { %v78_v6 = vsub.f32 %v69_v0, %v76_v5 }
  0xc9   :  { %v74_v7 = vpop.xlane.xlu0 %73 }
  0xca   :  { %v77_v8 = vmul.f32 0.0078125, %v74_v7  ;;  %v80_v9 = vmul.f32 %v78_v6, %v78_v6 }
  0xcc   :  { %v79_v10 = vsub.f32 %v70_v1, %v77_v8  ;;  %82 = vadd.xlane.f32.xlu1 %v80_v9 }
  0xce   :  { %v81_v11 = vmul.f32 %v79_v10, %v79_v10 }
  0xd0   :  { %84 = vadd.xlane.f32.xlu1 %v81_v11 }
 0x159   :  { %v83_v19 = vpop.xlane.xlu1 %82 }
 0x15a   :  { %v86_v20 = vmul.f32 0.0078125, %v83_v19 }
 0x15c   :  { %v88_v21 = vadd.f32 1e-05, %v86_v20 }
 0x15d   :  { %v85_v22 = vpop.xlane.xlu1 %84 }
 0x15e   :  { %482 = vrsqrt.f32 %v88_v21  ;;  %v87_v23 = vmul.f32 0.0078125, %v85_v22 }
 0x160   :  { %v89_v24 = vadd.f32 1e-05, %v87_v23 }
 0x162   :  { %484 = vrsqrt.f32 %v89_v24 }
 0x168   :  { %v483_v25 = vpop.eup %482 }
 0x169   :  { %v92_v26 = vmul.f32 %v483_v25, %v78_v6  ;;  %v389_v6 = vld [vmem:[%s738_s6] ss:$0 sm:$0xff] }
 0x16b   :  { %v101_v30 = vmul.f32 %v378_v27, %v92_v26 }
 0x16c   :  { %v485_v28 = vpop.eup %484 }
 0x16d   :  { %v93_v29 = vmul.f32 %v485_v28, %v79_v10  ;;  %v696_v33 = vadd.f32 %v379_v31, %v101_v30 }
 0x16f   :  { %v102_v32 = vmul.f32 %v378_v27, %v93_v29 }
 0x171   :  { %v698_v34 = vadd.f32 %v379_v31, %v102_v32 }
 0x173   :  { %v112_v35 = vpack.c.bf16 %v698_v34, %v696_v33 }
 0x175   :  { %433 = vmatmul.mubr.bf16.vlgmr.msra.gmra.mrb[0].mxu0 %v112_v35 }
 0x248   :  { %v218_v45 = vpop.f32.mrb[0].mxu0 }
 0x249   :  { %v219_v46 = vadd.f32 %v380_v44, %v218_v45  ;;  %v434_v47 = vpop.f32.mrb[1].mxu0 }
 0x24a   :  { %v221_v48 = vpop.f32.mrb[2].mxu0 }
 0x24b   :  { %v225_v49 = vmul.f32 %v219_v46, %v219_v46  ;;  %v222_v50 = vadd.f32 %v380_v44, %v221_v48  ;;  %v435_v51 = vpop.f32.mrb[3].mxu0 }
 0x24d   :  { %v227_v52 = vmul.f32 %v225_v49, %v219_v46  ;;  %v226_v53 = vmul.f32 %v222_v50, %v222_v50 }
 0x24f   :  { %v229_v54 = vmul.f32 0.044715, %v227_v52  ;;  %v228_v55 = vmul.f32 %v226_v53, %v222_v50 }
 0x251   :  { %v231_v56 = vadd.f32 %v229_v54, %v219_v46  ;;  %v230_v57 = vmul.f32 0.044715, %v228_v55 }
 0x253   :  { %v233_v58 = vmul.f32 0.7978846, %v231_v56  ;;  %v232_v59 = vadd.f32 %v230_v57, %v222_v50 }
 0x255   :  { %486 = vtanh.f32 %v233_v58  ;;  %v234_v60 = vmul.f32 0.7978846, %v232_v59 }
 0x257   :  { %488 = vtanh.f32 %v234_v60 }
 0x25f   :  { %v487_v61 = vpop.eup %486 }
 0x260   :  { %v237_v62 = vadd.f32 1.0, %v487_v61 }
 0x261   :  { %v489_v63 = vpop.eup %488 }
 0x262   :  { %v238_v0 = vadd.f32 1.0, %v489_v63  ;;  %v239_v1 = vmul.f32 0.5, %v237_v62 }
 0x264   :  { %v240_v2 = vmul.f32 0.5, %v238_v0  ;;  %v241_v3 = vmul.f32 %v239_v1, %v219_v46 }
 0x266   :  { %v242_v4 = vmul.f32 %v240_v2, %v222_v50 }
 0x268   :  { %v243_v5 = vpack.c.bf16 %v242_v4, %v241_v3 }
 0x26a   :  { %453 = vmatmul.mubr.bf16.vlgmr.msra.gmra.mrb[0].mxu1 %v243_v5 }
 0x33d   :  { %v349_v7 = vpop.f32.mrb[0].mxu1 }
 0x33e   :  { %v350_v8 = vadd.f32 %v389_v6, %v349_v7  ;;  %v454_v9 = vpop.f32.mrb[1].mxu1 }
 0x33f   :  { %v352_v10 = vpop.f32.mrb[2].mxu1 }
 0x340   :  { %v356_v11 = vadd.f32 %v350_v8, %v696_v33  ;;  %v353_v12 = vadd.f32 %v389_v6, %v352_v10  ;;  %v455_v13 = vpop.f32.mrb[3].mxu1 }
 0x342   :  { %358 = vst [vmem:[#allocation8] sm:$0xff] %v356_v11  ;;  %v357_v14 = vadd.f32 %v353_v12, %v698_v34 }
 0x344   :  { %359 = vst [vmem:[#allocation8 + $0x8] sm:$0xff] %v357_v14 }
 0x345   :  { %567 = shalt.err (!%p564_p0)
}
 0x346   :  { %s568_s24 = scalar_lea.hbm %s739_s7, 256 }
 0x347   :  { %p569_p1 = scmp.ne.s32.totalorder %s739_s7, %s568_s24  ;;  %p572_p2 = scmp.lt.u32.totalorder %s568_s24, %s739_s7 }
 0x349   :  { %p574_p3 = pnand %p572_p2, %p569_p1 }
 0x34b   :  { %577 = shalt.err (!%p574_p3)
}
 0x34c   :  { %371 = dma.vmem_to_hbm [thread:$0]  %s366_s21, 256, %s739_s7, [#allocation4], %s588_s3, %s588_s3, %s589_s25  }
 0x34d   :  { %582 = dma.done.wait [#allocation4], 256  }
 0x34e   :  { %583 = vsyncadd [#allocation4], 4294967040 }
 0x34f   :  { %375 = vsyncpa [#allocation3], 1 }
 0x350   :  { %376 = vsyncpa [#allocation6], 1 }
 0x351   :  { %377 = vsyncpa [#allocation4], 1 }

// kernel: tpu_custom_call.1
= control target key start
LH: loop header
LB: loop body
LE: loop exit
PB: predicated region body
PF: predicated region fallthrough
CT: control target
= control target key end

     0   :  { %12 = vsyncpa [#allocation3], 0  ;;  %s732_s0 = inlined_call_operand.hbm [shape: f32[16,128], index: 0, kind: input, shape index: {}]   ;;  %s733_s1 = inlined_call_operand.vmem [shape: f32[1,128], index: 1, kind: input, shape index: {}]   ;;  %s734_s2 = inlined_call_operand.vmem [shape: f32[1,128], index: 2, kind: input, shape index: {}]   ;;  %s735_s3 = inlined_call_operand.hbm [shape: bf16[128,128], index: 3, kind: input, shape index: {}]   ;;  %s736_s4 = inlined_call_operand.vmem [shape: f32[1,128], index: 4, kind: input, shape index: {}]   ;;  %s737_s5 = inlined_call_operand.hbm [shape: bf16[128,128], index: 5, kind: input, shape index: {}]   ;;  %s738_s6 = inlined_call_operand.vmem [shape: f32[1,128], index: 6, kind: input, shape index: {}]   ;;  %s739_s7 = inlined_call_operand.hbm [shape: f32[16,128], index: 7, kind: output, shape index: {}]  }
   0x1   :  { %13 = vsyncpa [#allocation6], 0 }
   0x2   :  { %14 = vsyncpa [#allocation4], 0  ;;  %s584_s24 = smov [#allocation5]   ;;  %s490_s28 = scalar_lea.hbm %s735_s3, 1024 }
   0x3   :  { %s36_s25 = sshll.u32 %s584_s24, 4  ;;  %p491_p0 = scmp.ne.s32.totalorder %s735_s3, %s490_s28  ;;  %s37_s25 = int_to_ptr.vmem [resolvable:$true] %s36_s25 }
   0x4   :  { %p494_p1 = scmp.lt.u32.totalorder %s490_s28, %s735_s3 }
   0x6   :  { %p496_p2 = pnand %p494_p1, %p491_p0 }
   0x8   :  { %499 = shalt.err (!%p496_p2)
}
   0x9   :  { %s500_s10 = scalar_lea.vmem %s37_s25, 1024  ;;  %p505_p4 = scmp.lt.s32.totalorder %s37_s25, %s37_s25 }
   0xa   :  { %p501_p3 = scmp.ne.s32.totalorder %s37_s25, %s500_s10  ;;  %p506_p5 = scmp.lt.s32.totalorder %s500_s10, %s500_s10 }
   0xc   :  { %p507_p6 = por %p506_p5, %p505_p4 }
   0xe   :  { %p508_p7 = pnand %p507_p6, %p501_p3 }
  0x10   :  { %511 = shalt.err (!%p508_p7)
}
  0x11   :  { %s585_s11 = smov 64   ;;  %s586_s12 = smov 4  }
  0x12   :  { %42 = dma.hbm_to_vmem [thread:$0]  %s735_s3, 1024, %s37_s25, [#allocation6], %s585_s11, %s585_s11, %s586_s12  }
  0x13   :  { %s587_s15 = smov [#allocation2]   ;;  %s512_s19 = scalar_lea.hbm %s732_s0, 256 }
  0x14   :  { %s20_s16 = sshll.u32 %s587_s15, 4  ;;  %p513_p8 = scmp.ne.s32.totalorder %s732_s0, %s512_s19  ;;  %s21_s16 = int_to_ptr.vmem [resolvable:$true] %s20_s16 }
  0x15   :  { %p516_p9 = scmp.lt.u32.totalorder %s512_s19, %s732_s0 }
  0x17   :  { %p518_p10 = pnand %p516_p9, %p513_p8 }
  0x19   :  { %521 = shalt.err (!%p518_p10)
}
  0x1a   :  { %s522_s24 = scalar_lea.vmem %s21_s16, 256  ;;  %p527_p12 = scmp.lt.s32.totalorder %s21_s16, %s21_s16 }
  0x1b   :  { %p523_p11 = scmp.ne.s32.totalorder %s21_s16, %s522_s24  ;;  %p528_p13 = scmp.lt.s32.totalorder %s522_s24, %s522_s24 }
  0x1d   :  { %p529_p0 = por %p528_p13, %p527_p12 }
  0x1f   :  { %p530_p1 = pnand %p529_p0, %p523_p11 }
  0x21   :  { %533 = shalt.err (!%p530_p1)
}
  0x22   :  { %s588_s3 = smov 128   ;;  %s589_s25 = smov 8  }
  0x23   :  { %26 = dma.hbm_to_vmem [thread:$0]  %s732_s0, 256, %s21_s16, [#allocation3], %s588_s3, %s588_s3, %s589_s25  }
  0x24   :  { %s590_s28 = smov [#allocation7]   ;;  %s534_s9 = scalar_lea.hbm %s737_s5, 1024 }
  0x25   :  { %s50_s29 = sshll.u32 %s590_s28, 4  ;;  %p535_p2 = scmp.ne.s32.totalorder %s737_s5, %s534_s9  ;;  %s51_s29 = int_to_ptr.vmem [resolvable:$true] %s50_s29 }
  0x26   :  { %p538_p3 = scmp.lt.u32.totalorder %s534_s9, %s737_s5 }
  0x28   :  { %p540_p4 = pnand %p538_p3, %p535_p2 }
  0x2a   :  { %543 = shalt.err (!%p540_p4)
}
  0x2b   :  { %s544_s17 = scalar_lea.vmem %s51_s29, 1024  ;;  %p549_p6 = scmp.lt.s32.totalorder %s51_s29, %s51_s29 }
  0x2c   :  { %p545_p5 = scmp.ne.s32.totalorder %s51_s29, %s544_s17  ;;  %p550_p7 = scmp.lt.s32.totalorder %s544_s17, %s544_s17 }
  0x2e   :  { %p551_p8 = por %p550_p7, %p549_p6 }
  0x30   :  { %p552_p9 = pnand %p551_p8, %p545_p5 }
  0x32   :  { %555 = shalt.err (!%p552_p9)
}
  0x33   :  { %56 = dma.hbm_to_vmem [thread:$0]  %s737_s5, 1024, %s51_s29, [#allocation6], %s585_s11, %s585_s11, %s586_s12  }
  0x34   :  { %578 = dma.done.wait [#allocation3], 256  }
  0x35   :  { %579 = vsyncadd [#allocation3], 4294967040 }
  0x36   :  { %580 = dma.done.wait [#allocation6], 2048  }
  0x37   :  { %581 = vsyncadd [#allocation6], 4294965248  ;;  %v69_v0 = vld [vmem:[#allocation2] sm:$0xff]  ;;  %v70_v1 = vld [vmem:[#allocation2 + $0x8] sm:$0xff]  ;;  %v591_v3 = vmov 0.0   ;;  %vm592_vm0 = vmmov 0  }
  0x38   :  { %71 = vadd.xlane.f32.xlu0 %v69_v0  ;;  %v466_v2 = vld [vmem:[#allocation5] sm:$0xff]   ;;  %416 = vmatprep.subr.bf16.mxu0 %v591_v3  ;;  %v467_v12 = vld [vmem:[#allocation5 + $0x8] sm:$0xff]   ;;  %v468_v13 = vld [vmem:[#allocation5 + $0x10] sm:$0xff]   ;;  %s593_s20 = smov [#allocation8]  }
  0x39   :  { %436 = vmatprep.subr.bf16.mxu1 %v591_v3  ;;  %417 = vmatpush3.bf16.msra.mxu0 %v466_v2  ;;  %v469_v14 = vld [vmem:[#allocation5 + $0x18] sm:$0xff]   ;;  %v470_v15 = vld [vmem:[#allocation5 + $0x20] sm:$0xff]   ;;  %v471_v16 = vld [vmem:[#allocation5 + $0x28] sm:$0xff]   ;;  %s365_s21 = sshll.u32 %s593_s20, 4  ;;  %s366_s21 = int_to_ptr.vmem [resolvable:$true] %s365_s21 }
  0x3a   :  { %418 = vmatprep.subr.bf16.mxu0 %v591_v3  ;;  %432 = vmatprep.mubr.msk.bf16.mxu0 %vm592_vm0, %v591_v3  ;;  %v472_v17 = vld [vmem:[#allocation5 + $0x30] sm:$0xff]   ;;  %v473_v18 = vld [vmem:[#allocation5 + $0x38] sm:$0xff]   ;;  %v474_v36 = vld [vmem:[#allocation7] sm:$0xff]   ;;  %s556_s22 = scalar_lea.vmem %s366_s21, 256  ;;  %p561_p11 = scmp.lt.s32.totalorder %s366_s21, %s366_s21 }
  0x3b   :  { %452 = vmatprep.mubr.msk.bf16.mxu1 %vm592_vm0, %v591_v3  ;;  %v378_v27 = vld [vmem:[%s733_s1] ss:$0 sm:$0xff]  ;;  %437 = vmatpush3.bf16.msra.mxu1 %v474_v36  ;;  %v475_v37 = vld [vmem:[#allocation7 + $0x8] sm:$0xff]   ;;  %v477_v39 = vld [vmem:[#allocation7 + $0x18] sm:$0xff]   ;;  %p557_p10 = scmp.ne.s32.totalorder %s366_s21, %s556_s22  ;;  %p562_p12 = scmp.lt.s32.totalorder %s556_s22, %s556_s22 }
  0x3c   :  { %73 = vadd.xlane.f32.xlu0 %v70_v1  ;;  %v379_v31 = vld [vmem:[%s734_s2] ss:$0 sm:$0xff]  ;;  %438 = vmatprep.subr.bf16.mxu1 %v591_v3  ;;  %v478_v40 = vld [vmem:[#allocation7 + $0x20] sm:$0xff]   ;;  %v479_v41 = vld [vmem:[#allocation7 + $0x28] sm:$0xff]  }
  0x3d   :  { %419 = vmatpush3.bf16.msra.mxu0 %v467_v12  ;;  %v476_v38 = vld [vmem:[#allocation7 + $0x10] sm:$0xff]   ;;  %v481_v43 = vld [vmem:[#allocation7 + $0x38] sm:$0xff]   ;;  %p563_p13 = por %p562_p12, %p561_p11 }
  0x3e   :  { %420 = vmatprep.subr.bf16.mxu0 %v591_v3  ;;  %v480_v42 = vld [vmem:[#allocation7 + $0x30] sm:$0xff]  }
  0x3f   :  { %439 = vmatpush3.bf16.msra.mxu1 %v475_v37  ;;  %v380_v44 = vld [vmem:[%s736_s4] ss:$0 sm:$0xff]  ;;  %p564_p0 = pnand %p563_p13, %p557_p10 }
  0x40   :  { %440 = vmatprep.subr.bf16.mxu1 %v591_v3 }
  0x41   :  { %421 = vmatpush3.bf16.msra.mxu0 %v468_v13 }
  0x42   :  { %422 = vmatprep.subr.bf16.mxu0 %v591_v3 }
  0x43   :  { %441 = vmatpush3.bf16.msra.mxu1 %v476_v38 }
  0x44   :  { %442 = vmatprep.subr.bf16.mxu1 %v591_v3 }
  0x45   :  { %423 = vmatpush3.bf16.msra.mxu0 %v469_v14 }
  0x46   :  { %424 = vmatprep.subr.bf16.mxu0 %v591_v3 }
  0x47   :  { %443 = vmatpush3.bf16.msra.mxu1 %v477_v39 }
  0x48   :  { %444 = vmatprep.subr.bf16.mxu1 %v591_v3 }
  0x49   :  { %425 = vmatpush3.bf16.msra.mxu0 %v470_v15 }
  0x4a   :  { %426 = vmatprep.subr.bf16.mxu0 %v591_v3 }
  0x4b   :  { %445 = vmatpush3.bf16.msra.mxu1 %v478_v40 }
  0x4c   :  { %446 = vmatprep.subr.bf16.mxu1 %v591_v3 }
  0x4d   :  { %427 = vmatpush3.bf16.msra.mxu0 %v471_v16 }
  0x4e   :  { %428 = vmatprep.subr.bf16.mxu0 %v591_v3 }
  0x4f   :  { %447 = vmatpush3.bf16.msra.mxu1 %v479_v41 }
  0x50   :  { %448 = vmatprep.subr.bf16.mxu1 %v591_v3 }
  0x51   :  { %429 = vmatpush3.bf16.msra.mxu0 %v472_v17 }
  0x52   :  { %430 = vmatprep.subr.bf16.mxu0 %v591_v3 }
  0x53   :  { %449 = vmatpush3.bf16.msra.mxu1 %v480_v42 }
  0x54   :  { %450 = vmatprep.subr.bf16.mxu1 %v591_v3 }
  0x55   :  { %431 = vmatpush3.bf16.msra.mxu0 %v473_v18 }
  0x57   :  { %451 = vmatpush3.bf16.msra.mxu1 %v481_v43 }
  0xc5   :  { %v72_v4 = vpop.xlane.xlu0 %71 }
  0xc6   :  { %v76_v5 = vmul.f32 0.0078125, %v72_v4 }
  0xc8   :  { %v78_v6 = vsub.f32 %v69_v0, %v76_v5 }
  0xc9   :  { %v74_v7 = vpop.xlane.xlu0 %73 }
  0xca   :  { %v77_v8 = vmul.f32 0.0078125, %v74_v7  ;;  %v80_v9 = vmul.f32 %v78_v6, %v78_v6 }
  0xcc   :  { %v79_v10 = vsub.f32 %v70_v1, %v77_v8  ;;  %82 = vadd.xlane.f32.xlu1 %v80_v9 }
  0xce   :  { %v81_v11 = vmul.f32 %v79_v10, %v79_v10 }
  0xd0   :  { %84 = vadd.xlane.f32.xlu1 %v81_v11 }
 0x159   :  { %v83_v19 = vpop.xlane.xlu1 %82 }
 0x15a   :  { %v86_v20 = vmul.f32 0.0078125, %v83_v19 }
 0x15c   :  { %v88_v21 = vadd.f32 1e-05, %v86_v20 }
 0x15d   :  { %v85_v22 = vpop.xlane.xlu1 %84 }
 0x15e   :  { %482 = vrsqrt.f32 %v88_v21  ;;  %v87_v23 = vmul.f32 0.0078125, %v85_v22 }
 0x160   :  { %v89_v24 = vadd.f32 1e-05, %v87_v23 }
 0x162   :  { %484 = vrsqrt.f32 %v89_v24 }
 0x168   :  { %v483_v25 = vpop.eup %482 }
 0x169   :  { %v92_v26 = vmul.f32 %v483_v25, %v78_v6  ;;  %v389_v6 = vld [vmem:[%s738_s6] ss:$0 sm:$0xff] }
 0x16b   :  { %v101_v30 = vmul.f32 %v378_v27, %v92_v26 }
 0x16c   :  { %v485_v28 = vpop.eup %484 }
 0x16d   :  { %v93_v29 = vmul.f32 %v485_v28, %v79_v10  ;;  %v696_v33 = vadd.f32 %v379_v31, %v101_v30 }
 0x16f   :  { %v102_v32 = vmul.f32 %v378_v27, %v93_v29 }
 0x171   :  { %v698_v34 = vadd.f32 %v379_v31, %v102_v32 }
 0x173   :  { %v112_v35 = vpack.c.bf16 %v698_v34, %v696_v33 }
 0x175   :  { %433 = vmatmul.mubr.bf16.vlgmr.msra.gmra.mrb[0].mxu0 %v112_v35 }
 0x248   :  { %v218_v45 = vpop.f32.mrb[0].mxu0 }
 0x249   :  { %v219_v46 = vadd.f32 %v380_v44, %v218_v45  ;;  %v434_v47 = vpop.f32.mrb[1].mxu0 }
 0x24a   :  { %v221_v48 = vpop.f32.mrb[2].mxu0 }
 0x24b   :  { %v225_v49 = vmul.f32 %v219_v46, %v219_v46  ;;  %v222_v50 = vadd.f32 %v380_v44, %v221_v48  ;;  %v435_v51 = vpop.f32.mrb[3].mxu0 }
 0x24d   :  { %v227_v52 = vmul.f32 %v225_v49, %v219_v46  ;;  %v226_v53 = vmul.f32 %v222_v50, %v222_v50 }
 0x24f   :  { %v229_v54 = vmul.f32 0.044715, %v227_v52  ;;  %v228_v55 = vmul.f32 %v226_v53, %v222_v50 }
 0x251   :  { %v231_v56 = vadd.f32 %v229_v54, %v219_v46  ;;  %v230_v57 = vmul.f32 0.044715, %v228_v55 }
 0x253   :  { %v233_v58 = vmul.f32 0.7978846, %v231_v56  ;;  %v232_v59 = vadd.f32 %v230_v57, %v222_v50 }
 0x255   :  { %486 = vtanh.f32 %v233_v58  ;;  %v234_v60 = vmul.f32 0.7978846, %v232_v59 }
 0x257   :  { %488 = vtanh.f32 %v234_v60 }
 0x25f   :  { %v487_v61 = vpop.eup %486 }
 0x260   :  { %v237_v62 = vadd.f32 1.0, %v487_v61 }
 0x261   :  { %v489_v63 = vpop.eup %488 }
 0x262   :  { %v238_v0 = vadd.f32 1.0, %v489_v63  ;;  %v239_v1 = vmul.f32 0.5, %v237_v62 }
 0x264   :  { %v240_v2 = vmul.f32 0.5, %v238_v0  ;;  %v241_v3 = vmul.f32 %v239_v1, %v219_v46 }
 0x266   :  { %v242_v4 = vmul.f32 %v240_v2, %v222_v50 }
 0x268   :  { %v243_v5 = vpack.c.bf16 %v242_v4, %v241_v3 }
 0x26a   :  { %453 = vmatmul.mubr.bf16.vlgmr.msra.gmra.mrb[0].mxu1 %v243_v5 }
 0x33d   :  { %v349_v7 = vpop.f32.mrb[0].mxu1 }
 0x33e   :  { %v350_v8 = vadd.f32 %v389_v6, %v349_v7  ;;  %v454_v9 = vpop.f32.mrb[1].mxu1 }
 0x33f   :  { %v352_v10 = vpop.f32.mrb[2].mxu1 }
 0x340   :  { %v356_v11 = vadd.f32 %v350_v8, %v696_v33  ;;  %v353_v12 = vadd.f32 %v389_v6, %v352_v10  ;;  %v455_v13 = vpop.f32.mrb[3].mxu1 }
 0x342   :  { %358 = vst [vmem:[#allocation8] sm:$0xff] %v356_v11  ;;  %v357_v14 = vadd.f32 %v353_v12, %v698_v34 }
 0x344   :  { %359 = vst [vmem:[#allocation8 + $0x8] sm:$0xff] %v357_v14 }
 0x345   :  { %567 = shalt.err (!%p564_p0)
}
 0x346   :  { %s568_s24 = scalar_lea.hbm %s739_s7, 256 }
 0x347   :  { %p569_p1 = scmp.ne.s32.totalorder %s739_s7, %s568_s24  ;;  %p572_p2 = scmp.lt.u32.totalorder %s568_s24, %s739_s7 }
 0x349   :  { %p574_p3 = pnand %p572_p2, %p569_p1 }
 0x34b   :  { %577 = shalt.err (!%p574_p3)
}
 0x34c   :  { %371 = dma.vmem_to_hbm [thread:$0]  %s366_s21, 256, %s739_s7, [#allocation4], %s588_s3, %s588_s3, %s589_s25  }
 0x34d   :  { %582 = dma.done.wait [#allocation4], 256  }
 0x34e   :  { %583 = vsyncadd [#allocation4], 4294967040 }
 0x34f   :  { %375 = vsyncpa [#allocation3], 1 }
 0x350   :  { %376 = vsyncpa [#allocation6], 1 }
 0x351   :  { %377 = vsyncpa [#allocation4], 1 }

</bundles_post_ra>
